<compile_context>
chip_gen: v6e
topology: v6e:2x2x1
jax: 0.10.0
libtpu: 0.0.40
codegen_flags: <defaults>
</compile_context>

<pallas_src>
import jax
import jax.numpy as jnp
from jax.experimental import pallas as pl
from jax.experimental.pallas import tpu as pltpu


def _eca_kernel(sf_ref, ev_ref, lblr_ref, lblc_ref,
                w_in_ref, b_in_ref, w_out_ref, b_out_ref,
                out_ref):
    NK, D = sf_ref.shape
    N = ev_ref.shape[0]

    sf = sf_ref[...]          # [NK, D]   support features (this episode)
    ev = ev_ref[...]          # [N, D]    entity vectors
    lbl_row = lblr_ref[...]   # [1, NK]   labels, lane-dense layout
    lbl_col = lblc_ref[...]   # [NK, 1]   labels, sublane layout

    # Packed projections (MXU matmuls, fp32 accumulate).
    #   q_pad = [Q/sqrt(D) | 0]   [N, 2D]
    #   kv    = [K | V]           [NK, 2D]
    q_pad = jnp.dot(ev, w_in_ref[0], preferred_element_type=jnp.float32) + b_in_ref[0]
    kv = jnp.dot(sf, w_in_ref[1], preferred_element_type=jnp.float32) + b_in_ref[1]

    # scores = (Q/sqrt(D)) @ K^T as an NT matmul over the packed 2D contraction;
    # the zero half of q_pad annihilates the V contribution.  No transpose.
    scores = jax.lax.dot_general(
        q_pad, kv, dimension_numbers=(((1,), (1,)), ((), ())),
        preferred_element_type=jnp.float32)                                # [N, NK]

    # Class-membership masks, each built directly in the orientation used.
    mask = (lbl_row == jax.lax.broadcasted_iota(jnp.int32, (N, NK), 0))    # [N, NK]
    onehot = (lbl_col == jax.lax.broadcasted_iota(jnp.int32, (NK, N), 1))  # [NK, N]

    # Masked, numerically stable softmax over the members of each class.
    # -1e30 (not -inf): an empty class yields a finite garbage row that the
    # one-hot scatter never reads; -inf would give NaN via inf - inf.
    masked = jnp.where(mask, scores, jnp.float32(-1e30))
    m = jnp.max(masked, axis=-1, keepdims=True)
    e = jnp.exp(masked - m)
    denom = jnp.sum(e, axis=-1, keepdims=True)
    w = e * pl.reciprocal(denom, approx=True)                              # [N, NK]

    # attended2 = [w@K | w@V]; the zero-padded out projection keeps only w@V.
    attended2 = jnp.dot(w, kv, preferred_element_type=jnp.float32)         # [N, 2D]
    cls_out = jnp.dot(attended2, w_out_ref[...],
                      preferred_element_type=jnp.float32) + b_out_ref[...]  # [N, D]

    # Scatter each class refinement back to its member samples + residual add.
    add = jnp.dot(onehot.astype(jnp.float32), cls_out,
                  preferred_element_type=jnp.float32)                       # [NK, D]
    out_ref[...] = sf + add


def pack_params(params, D):
    """One-time host-side packing of the 4 nn.Linear layers.

    Fuses K|V into one weight, folds 1/sqrt(D) into Q, zero-pads Q and the out
    projection so the kernel never slices/transposes weights, and collapses
    8 weight/bias inputs into 4.
    """
    scale = 1.0 / float(D) ** 0.5
    zw = jnp.zeros((D, D), jnp.float32)
    zb = jnp.zeros((1, D), jnp.float32)
    w_q = jnp.concatenate([params["wq"] * scale, zw], axis=1)      # [D, 2D]
    b_q = jnp.concatenate([params["bq"] * scale, zb], axis=1)      # [1, 2D]
    w_kv = jnp.concatenate([params["wk"], params["wv"]], axis=1)   # [D, 2D]
    b_kv = jnp.concatenate([params["bk"], params["bv"]], axis=1)   # [1, 2D]
    return dict(
        w_in=jnp.stack([w_q, w_kv], axis=0),                       # [2, D, 2D]
        b_in=jnp.stack([b_q, b_kv], axis=0),                       # [2, 1, 2D]
        w_out=jnp.concatenate([zw, params["wo"]], axis=0),         # [2D, D]
        b_out=params["bo"],                                        # [1, D]
    )


def entity_guided_cross_attention(support_features, entity_vectors,
                                  support_labels, packed):
    """Batched forward.

    support_features: [E, N*K, D] float32
    entity_vectors:   [E, N, D]   float32
    support_labels:   [E, N*K]    int
    packed:           output of pack_params()
    returns:          [E, N*K, D] float32
    """
    E, NK, D = support_features.shape
    N = entity_vectors.shape[1]

    lbl = support_labels.astype(jnp.int32)
    lbl_row = lbl.reshape(E, 1, NK)   # lane-dense layout for the softmax mask
    lbl_col = lbl.reshape(E, NK, 1)   # sublane layout for the scatter one-hot

    ep3 = lambda e: (e, 0, 0)         # one episode per grid step
    const3 = lambda e: (0, 0, 0)      # weights: VMEM-resident across the grid
    const2 = lambda e: (0, 0)
    sq = pl.Squeezed()

    grid_spec = pltpu.PrefetchScalarGridSpec(
        num_scalar_prefetch=0,
        grid=(E,),
        in_specs=[
            pl.BlockSpec((sq, NK, D), ep3),        # support_features
            pl.BlockSpec((sq, N, D), ep3),         # entity_vectors
            pl.BlockSpec((sq, 1, NK), ep3),        # labels (row layout)
            pl.BlockSpec((sq, NK, 1), ep3),        # labels (col layout)
            pl.BlockSpec((2, D, 2 * D), const3),   # w_in  = [q|0 , k|v]
            pl.BlockSpec((2, 1, 2 * D), const3),   # b_in
            pl.BlockSpec((2 * D, D), const2),      # w_out = [0 ; wo]
            pl.BlockSpec((1, D), const2),          # b_out
        ],
        out_specs=pl.BlockSpec((sq, NK, D), ep3),
    )

    return pl.pallas_call(
        _eca_kernel,
        out_shape=jax.ShapeDtypeStruct((E, NK, D), jnp.float32),
        grid_spec=grid_spec,
        compiler_params=pltpu.CompilerParams(
            # Episodes are independent -> shard across TensorCores on v7x.
            dimension_semantics=("parallel",)),
    )(support_features, entity_vectors, lbl_row, lbl_col,
      packed["w_in"], packed["b_in"], packed["w_out"], packed["b_out"])


def _reference_episode(support_features, entity_vectors, support_labels, params):
    """Pure-JAX mirror of the PyTorch forward (per-class python loop), one episode."""
    NK, D = support_features.shape
    N = entity_vectors.shape[0]
    k_proj = support_features @ params["wk"] + params["bk"]
    v_proj = support_features @ params["wv"] + params["bv"]
    refined = jnp.zeros_like(support_features)
    labels_np = jax.device_get(support_labels)
    for c in range(N):
        idx = [i for i in range(NK) if int(labels_np[i]) == c]
        if not idx:
            continue
        idx = jnp.array(idx)
        Q = entity_vectors[c:c + 1] @ params["wq"] + params["bq"]
        scores = (Q @ k_proj[idx].T) / jnp.sqrt(jnp.float32(D))
        w = jax.nn.softmax(scores, axis=-1)
        attended = w @ v_proj[idx]
        out = attended @ params["wo"] + params["bo"]
        refined = refined.at[idx].set(support_features[idx] + out)
    return refined


if __name__ == "__main__":
    # Small episodic shapes: E batched episodes, N classes, K shots, D features.
    E, N, K, D = 3, 4, 2, 32
    NK = N * K

    key = jax.random.PRNGKey(0)
    keys = jax.random.split(key, 12)

    support_features = jax.random.normal(keys[0], (E, NK, D), dtype=jnp.float32)
    entity_vectors = jax.random.normal(keys[1], (E, N, D), dtype=jnp.float32)
    support_labels = jnp.array(
        [[0, 0, 1, 1, 2, 2, 3, 3],    # balanced episode
         [3, 1, 0, 2, 1, 0, 2, 3],    # shuffled labels
         [1, 1, 1, 0, 2, 2, 2, 0]],   # class 3 empty (exercises masked path)
        dtype=jnp.int32)

    def init_linear(kw, kb):
        w = jax.random.normal(kw, (D, D), dtype=jnp.float32) * 0.1
        b = jax.random.normal(kb, (1, D), dtype=jnp.float32) * 0.01
        return w, b

    wq, bq = init_linear(keys[2], keys[3])
    wk, bk = init_linear(keys[4], keys[5])
    wv, bv = init_linear(keys[6], keys[7])
    wo, bo = init_linear(keys[8], keys[9])
    params = dict(wq=wq, bq=bq, wk=wk, bk=bk, wv=wv, bv=bv, wo=wo, bo=bo)

    packed = pack_params(params, D)

    out = entity_guided_cross_attention(support_features, entity_vectors,
                                        support_labels, packed)
    out = jax.block_until_ready(out)

    ref = jnp.stack([
        _reference_episode(support_features[e], entity_vectors[e],
                           support_labels[e], params) for e in range(E)])

    assert out.shape == (E, NK, D) and out.dtype == jnp.float32
    # 2e-3 tolerance: pl.reciprocal(approx=True) adds ~1e-4 relative error in the
    # softmax normalization; everything else matches to f32 rounding.
    assert jnp.allclose(out, ref, atol=2e-3, rtol=2e-3), "mismatch vs reference"

    print("KERNEL_OK")
</pallas_src>

<mosaic_0001>
module attributes {stable_mosaic.version = 11 : i64} {
  func.func @_eca_kernel(%arg0: i32, %arg1: memref<1x8x32xf32, #tpu.memory_space<vmem>>, %arg2: memref<1x4x32xf32, #tpu.memory_space<vmem>>, %arg3: memref<1x1x8xi32, #tpu.memory_space<vmem>>, %arg4: memref<1x8x1xi32, #tpu.memory_space<vmem>>, %arg5: memref<2x32x64xf32, #tpu.memory_space<vmem>>, %arg6: memref<2x1x64xf32, #tpu.memory_space<vmem>>, %arg7: memref<64x32xf32, #tpu.memory_space<vmem>>, %arg8: memref<1x32xf32, #tpu.memory_space<vmem>>, %arg9: memref<1x8x32xf32, #tpu.memory_space<vmem>>) attributes {dimension_semantics = [#tpu.dimension_semantics<parallel>], iteration_bounds = array<i64: 3>, scalar_prefetch = 0 : i64, scratch_operands = 0 : i64, tpu.core_type = #tpu.core_type<tc>, window_params = [{transform_indices = @transform_0, window_bounds = array<i64: 1, 8, 32>}, {transform_indices = @transform_1, window_bounds = array<i64: 1, 4, 32>}, {transform_indices = @transform_2, window_bounds = array<i64: 1, 1, 8>}, {transform_indices = @transform_3, window_bounds = array<i64: 1, 8, 1>}, {pipeline_mode = #tpu.pipeline_mode<synchronous>, transform_indices = @transform_4, window_bounds = array<i64: 2, 32, 64>}, {pipeline_mode = #tpu.pipeline_mode<synchronous>, transform_indices = @transform_5, window_bounds = array<i64: 2, 1, 64>}, {pipeline_mode = #tpu.pipeline_mode<synchronous>, transform_indices = @transform_6, window_bounds = array<i64: 64, 32>}, {pipeline_mode = #tpu.pipeline_mode<synchronous>, transform_indices = @transform_7, window_bounds = array<i64: 1, 32>}, {transform_indices = @transform_8, window_bounds = array<i64: 1, 8, 32>}]} {
    %c0 = arith.constant 0 : index
    %c0_0 = arith.constant 0 : index
    %c0_1 = arith.constant 0 : index
    %0 = vector.load %arg1[%c0, %c0_0, %c0_1] : memref<1x8x32xf32, #tpu.memory_space<vmem>>, vector<1x8x32xf32>
    %1 = vector.shape_cast %0 : vector<1x8x32xf32> to vector<8x32xf32>
    %c0_2 = arith.constant 0 : index
    %c0_3 = arith.constant 0 : index
    %c0_4 = arith.constant 0 : index
    %2 = vector.load %arg2[%c0_2, %c0_3, %c0_4] : memref<1x4x32xf32, #tpu.memory_space<vmem>>, vector<1x4x32xf32>
    %3 = vector.shape_cast %2 : vector<1x4x32xf32> to vector<4x32xf32>
    %c0_5 = arith.constant 0 : index
    %c0_6 = arith.constant 0 : index
    %c0_7 = arith.constant 0 : index
    %4 = vector.load %arg3[%c0_5, %c0_6, %c0_7] : memref<1x1x8xi32, #tpu.memory_space<vmem>>, vector<1x1x8xi32>
    %5 = vector.shape_cast %4 : vector<1x1x8xi32> to vector<1x8xi32>
    %c0_8 = arith.constant 0 : index
    %c0_9 = arith.constant 0 : index
    %c0_10 = arith.constant 0 : index
    %6 = vector.load %arg4[%c0_8, %c0_9, %c0_10] : memref<1x8x1xi32, #tpu.memory_space<vmem>>, vector<1x8x1xi32>
    %7 = vector.shape_cast %6 : vector<1x8x1xi32> to vector<8x1xi32>
    %c0_11 = arith.constant 0 : index
    %c0_12 = arith.constant 0 : index
    %c0_13 = arith.constant 0 : index
    %8 = vector.load %arg5[%c0_11, %c0_12, %c0_13] : memref<2x32x64xf32, #tpu.memory_space<vmem>>, vector<1x32x64xf32>
    %9 = vector.shape_cast %8 : vector<1x32x64xf32> to vector<32x64xf32>
    %cst = arith.constant dense<0.000000e+00> : vector<4x64xf32>
    %10 = tpu.matmul %3, %9, %cst {dimension_numbers = #tpu.dot_dimension_numbers<[1], [0], [0], [1], [0, 0, 1, 1], [], []>} : vector<4x32xf32>, vector<32x64xf32>, vector<4x64xf32> -> vector<4x64xf32>
    %c0_14 = arith.constant 0 : index
    %c0_15 = arith.constant 0 : index
    %c0_16 = arith.constant 0 : index
    %11 = vector.load %arg6[%c0_14, %c0_15, %c0_16] : memref<2x1x64xf32, #tpu.memory_space<vmem>>, vector<1x1x64xf32>
    %12 = vector.shape_cast %11 : vector<1x1x64xf32> to vector<1x64xf32>
    %13 = vector.broadcast %12 : vector<1x64xf32> to vector<4x64xf32>
    %14 = arith.addf %10, %13 : vector<4x64xf32>
    %c1 = arith.constant 1 : index
    %c0_17 = arith.constant 0 : index
    %c0_18 = arith.constant 0 : index
    %15 = vector.load %arg5[%c1, %c0_17, %c0_18] : memref<2x32x64xf32, #tpu.memory_space<vmem>>, vector<1x32x64xf32>
    %16 = vector.shape_cast %15 : vector<1x32x64xf32> to vector<32x64xf32>
    %cst_19 = arith.constant dense<0.000000e+00> : vector<8x64xf32>
    %17 = tpu.matmul %1, %16, %cst_19 {dimension_numbers = #tpu.dot_dimension_numbers<[1], [0], [0], [1], [0, 0, 1, 1], [], []>} : vector<8x32xf32>, vector<32x64xf32>, vector<8x64xf32> -> vector<8x64xf32>
    %c1_20 = arith.constant 1 : index
    %c0_21 = arith.constant 0 : index
    %c0_22 = arith.constant 0 : index
    %18 = vector.load %arg6[%c1_20, %c0_21, %c0_22] : memref<2x1x64xf32, #tpu.memory_space<vmem>>, vector<1x1x64xf32>
    %19 = vector.shape_cast %18 : vector<1x1x64xf32> to vector<1x64xf32>
    %20 = vector.broadcast %19 : vector<1x64xf32> to vector<8x64xf32>
    %21 = arith.addf %17, %20 : vector<8x64xf32>
    %cst_23 = arith.constant dense<0.000000e+00> : vector<4x8xf32>
    %22 = tpu.matmul %14, %21, %cst_23 {dimension_numbers = #tpu.dot_dimension_numbers<[1], [1], [0], [0], [0, 0, 1, 0], [], []>} : vector<4x64xf32>, vector<8x64xf32>, vector<4x8xf32> -> vector<4x8xf32>
    %23 = tpu.iota {dimensions = array<i32: 0>} : vector<4x8xi32>
    %24 = vector.broadcast %5 : vector<1x8xi32> to vector<4x8xi32>
    %25 = arith.cmpi eq, %24, %23 : vector<4x8xi32>
    %26 = tpu.iota {dimensions = array<i32: 1>} : vector<8x4xi32>
    %27 = vector.broadcast %7 : vector<8x1xi32> to vector<8x4xi32>
    %28 = arith.cmpi eq, %27, %26 : vector<8x4xi32>
    %cst_24 = arith.constant -1.000000e+30 : f32
    %29 = vector.broadcast %cst_24 : f32 to vector<4x8xf32>
    %30 = arith.select %25, %22, %29 : vector<4x8xi1>, vector<4x8xf32>
    %cst_25 = arith.constant dense<0xFF800000> : vector<4xf32>
    %31 = vector.multi_reduction <maximumf>, %30, %cst_25 [1] : vector<4x8xf32> to vector<4xf32>
    %32 = vector.shape_cast %31 : vector<4xf32> to vector<4x1xf32>
    %33 = vector.broadcast %32 : vector<4x1xf32> to vector<4x8xf32>
    %34 = arith.subf %30, %33 : vector<4x8xf32>
    %35 = math.exp %34 : vector<4x8xf32>
    %cst_26 = arith.constant dense<0.000000e+00> : vector<4xf32>
    %36 = vector.multi_reduction <add>, %35, %cst_26 [1] : vector<4x8xf32> to vector<4xf32>
    %37 = vector.shape_cast %36 : vector<4xf32> to vector<4x1xf32>
    %38 = tpu.reciprocal %37 {approx = true} : vector<4x1xf32> -> vector<4x1xf32>
    %39 = vector.broadcast %38 : vector<4x1xf32> to vector<4x8xf32>
    %40 = arith.mulf %35, %39 : vector<4x8xf32>
    %cst_27 = arith.constant dense<0.000000e+00> : vector<4x64xf32>
    %41 = tpu.matmul %40, %21, %cst_27 {dimension_numbers = #tpu.dot_dimension_numbers<[1], [0], [0], [1], [0, 0, 1, 1], [], []>} : vector<4x8xf32>, vector<8x64xf32>, vector<4x64xf32> -> vector<4x64xf32>
    %c0_28 = arith.constant 0 : index
    %c0_29 = arith.constant 0 : index
    %42 = vector.load %arg7[%c0_28, %c0_29] : memref<64x32xf32, #tpu.memory_space<vmem>>, vector<64x32xf32>
    %cst_30 = arith.constant dense<0.000000e+00> : vector<4x32xf32>
    %43 = tpu.matmul %41, %42, %cst_30 {dimension_numbers = #tpu.dot_dimension_numbers<[1], [0], [0], [1], [0, 0, 1, 1], [], []>} : vector<4x64xf32>, vector<64x32xf32>, vector<4x32xf32> -> vector<4x32xf32>
    %c0_31 = arith.constant 0 : index
    %c0_32 = arith.constant 0 : index
    %44 = vector.load %arg8[%c0_31, %c0_32] : memref<1x32xf32, #tpu.memory_space<vmem>>, vector<1x32xf32>
    %45 = vector.broadcast %44 : vector<1x32xf32> to vector<4x32xf32>
    %46 = arith.addf %43, %45 : vector<4x32xf32>
    %47 = arith.extui %28 : vector<8x4xi1> to vector<8x4xi32>
    %48 = arith.sitofp %47 : vector<8x4xi32> to vector<8x4xf32>
    %cst_33 = arith.constant dense<0.000000e+00> : vector<8x32xf32>
    %49 = tpu.matmul %48, %46, %cst_33 {dimension_numbers = #tpu.dot_dimension_numbers<[1], [0], [0], [1], [0, 0, 1, 1], [], []>} : vector<8x4xf32>, vector<4x32xf32>, vector<8x32xf32> -> vector<8x32xf32>
    %50 = arith.addf %1, %49 : vector<8x32xf32>
    %c0_34 = arith.constant 0 : index
    %c0_35 = arith.constant 0 : index
    %c0_36 = arith.constant 0 : index
    %51 = vector.load %arg9[%c0_34, %c0_35, %c0_36] : memref<1x8x32xf32, #tpu.memory_space<vmem>>, vector<1x8x32xf32>
    %52 = vector.shape_cast %51 : vector<1x8x32xf32> to vector<8x32xf32>
    %53 = vector.shape_cast %50 : vector<8x32xf32> to vector<1x8x32xf32>
    tpu.vector_store %arg9[%c0_34, %c0_35, %c0_36], %53 {strides = array<i32>} : memref<1x8x32xf32, #tpu.memory_space<vmem>>, vector<1x8x32xf32>,
    return
  }
  func.func @transform_0(%arg0: i32) -> (i32, i32, i32) {
    %c0_i32 = arith.constant 0 : i32
    %c0_i32_0 = arith.constant 0 : i32
    %c0_i32_1 = arith.constant 0 : i32
    return %arg0, %c0_i32, %c0_i32_0 : i32, i32, i32
  }
  func.func @transform_1(%arg0: i32) -> (i32, i32, i32) {
    %c0_i32 = arith.constant 0 : i32
    %c0_i32_0 = arith.constant 0 : i32
    %c0_i32_1 = arith.constant 0 : i32
    return %arg0, %c0_i32, %c0_i32_0 : i32, i32, i32
  }
  func.func @transform_2(%arg0: i32) -> (i32, i32, i32) {
    %c0_i32 = arith.constant 0 : i32
    %c0_i32_0 = arith.constant 0 : i32
    %c0_i32_1 = arith.constant 0 : i32
    return %arg0, %c0_i32, %c0_i32_0 : i32, i32, i32
  }
  func.func @transform_3(%arg0: i32) -> (i32, i32, i32) {
    %c0_i32 = arith.constant 0 : i32
    %c0_i32_0 = arith.constant 0 : i32
    %c0_i32_1 = arith.constant 0 : i32
    return %arg0, %c0_i32, %c0_i32_0 : i32, i32, i32
  }
  func.func @transform_4(%arg0: i32) -> (i32, i32, i32) {
    %c0_i32 = arith.constant 0 : i32
    %c0_i32_0 = arith.constant 0 : i32
    %c0_i32_1 = arith.constant 0 : i32
    %c0_i32_2 = arith.constant 0 : i32
    return %c0_i32, %c0_i32_0, %c0_i32_1 : i32, i32, i32
  }
  func.func @transform_5(%arg0: i32) -> (i32, i32, i32) {
    %c0_i32 = arith.constant 0 : i32
    %c0_i32_0 = arith.constant 0 : i32
    %c0_i32_1 = arith.constant 0 : i32
    %c0_i32_2 = arith.constant 0 : i32
    return %c0_i32, %c0_i32_0, %c0_i32_1 : i32, i32, i32
  }
  func.func @transform_6(%arg0: i32) -> (i32, i32) {
    %c0_i32 = arith.constant 0 : i32
    %c0_i32_0 = arith.constant 0 : i32
    %c0_i32_1 = arith.constant 0 : i32
    return %c0_i32, %c0_i32_0 : i32, i32
  }
  func.func @transform_7(%arg0: i32) -> (i32, i32) {
    %c0_i32 = arith.constant 0 : i32
    %c0_i32_0 = arith.constant 0 : i32
    %c0_i32_1 = arith.constant 0 : i32
    return %c0_i32, %c0_i32_0 : i32, i32
  }
  func.func @transform_8(%arg0: i32) -> (i32, i32, i32) {
    %c0_i32 = arith.constant 0 : i32
    %c0_i32_0 = arith.constant 0 : i32
    %c0_i32_1 = arith.constant 0 : i32
    return %arg0, %c0_i32, %c0_i32_0 : i32, i32, i32
  }
}

</mosaic_0001>

<bundles_post_ra>
// kernel: tpu_custom_call.1
= control target key start
LH: loop header
LB: loop body
LE: loop exit
PB: predicated region body
PF: predicated region fallthrough
CT: control target
= control target key end

     0   :  { %s1664_s0 = inlined_call_operand.vmem [shape: f32[3,8,32], index: 0, kind: input, shape index: {}]   ;;  %s1665_s1 = inlined_call_operand.vmem [shape: f32[3,4,32], index: 1, kind: input, shape index: {}]   ;;  %s1666_s2 = inlined_call_operand.hbm [shape: s32[3,1,8], index: 2, kind: input, shape index: {}]   ;;  %s1667_s3 = inlined_call_operand.vmem [shape: s32[3,8,1], index: 3, kind: input, shape index: {}]   ;;  %s1668_s4 = inlined_call_operand.vmem [shape: f32[2,32,64], index: 4, kind: input, shape index: {}]   ;;  %s1669_s5 = inlined_call_operand.hbm [shape: f32[2,1,64], index: 5, kind: input, shape index: {}]   ;;  %s1670_s6 = inlined_call_operand.vmem [shape: f32[64,32], index: 6, kind: input, shape index: {}]   ;;  %s1671_s7 = inlined_call_operand.vmem [shape: f32[1,32], index: 7, kind: input, shape index: {}]   ;;  %s1672_s8 = inlined_call_operand.hbm [shape: f32[3,8,32], index: 8, kind: output, shape index: {}]  }
   0x1   :  { %1679 = sst [smem:[#allocation13_spill]] %s1669_s5 }
   0x2   :  { %13 = vsyncpa [#allocation3], 0 }
   0x3   :  { %15 = vsyncpa [#allocation3 + $0x1], 0 }
   0x4   :  { %16 = vsyncpa [#allocation6], 0 }
   0x5   :  { %17 = vsyncpa [#allocation4], 0 }
   0x6   :  { %19 = vsyncpa [#allocation4 + $0x1], 0  ;;  %s1391_s27 = smov 0   ;;  %s1393_s28 = smov 0  }
   0x7   :  { %s1395_s29 = smov 0   ;;  %s1397_s30 = smov 0  }
   0x8 LB: > { %s1412_s9 = sadd.s32 4294967295, %s1336_s30   ;;  %s1033_s10 = sadd.s32 4294967294, %s1336_s30   ;;  %s1336_s30 = sphi %s1397_s30, %s1696_s30   ;;  %s1332_s29 = sphi %s1395_s29, %s1700_s29   ;;  %s1328_s28 = sphi %s1393_s28, %s1699_s28   ;;  %s1324_s27 = sphi %s1391_s27, %s1698_s27  }
   0x9   : > { %p97_p0 = scmp.ne.s32.totalorder %s1328_s28, %s1324_s27  ;;  %p1675_p1 = scmp.eq.s32.totalorder %s1412_s9, 0 }
   0xa   : > { %p237_p3 = scmp.eq.s32.totalorder %s1033_s10, 2  ;;  %p1034_p5 = scmp.ge.s32.totalorder %s1336_s30, 1 }
   0xb   : > { %p1421_p4 = por %p1675_p1, %p97_p0  ;;  %p244_p7 = scmp.lt.s32.totalorder %s1336_s30, 4 }
   0xc   : > { %p1426_p6 = por %p237_p3, %p97_p0  ;;  %s1338_s14 = smov [#allocation5]  }
   0xd   : > { %s1680_s11 = scalar_select %p1421_p4, 1, 0 }
   0xe   : > { %s1681_s12 = scalar_select %p1426_p6, 1, 0 }
   0xf   : > { %p1431_p8 = pnand %p1034_p5, %p244_p7  ;;  %s259_s15 = sshll.u32 %s1338_s14, 4  ;;  %s260_s15 = int_to_ptr.vmem [resolvable:$true] %s259_s15 }
  0x10   : > { %s1444_s17 = sadd.s32 1, %s1336_s30   ;;  %s84_s18 = sadd.s32 1, %s1332_s29 }
  0x11   : > { %s1682_s13 = scalar_select %p1431_p8, 1, 0 }
  0x12   : > { %p1154_p9 = pneg %p1431_p8  ;;  %1684 = sst [smem:[#allocation11_spill]] %s1444_s17 }
  0x13   : > { %s81_s19 = ssub.s32 %s1336_s30, %s1444_s17  ;;  %s1225_s20 = scalar_lea.vmem %s260_s15, 32 }
  0x14   : > { %p1439_p10 = pnand %p1154_p9, %p1675_p1  ;;  %p1226_p12 = scmp.ne.s32.totalorder %s260_s15, %s1225_s20 }
  0x15   : > { %p1233_p3 = scmp.lt.s32.totalorder %s260_s15, %s260_s15  ;;  %p1234_p5 = scmp.lt.s32.totalorder %s1225_s20, %s1225_s20 }
  0x16   : > { %p1216_p11 = pneg %p1439_p10 }
  0x17   : > { %p1235_p7 = por %p1234_p5, %p1233_p3 }
  0x18   : > { %p1228_p13 = pnand %p1226_p12, %p1216_p11 }
  0x1a   : > { %p1229_p0 = pneg %p1228_p13 }
  0x1c   : > { %p1236_p2 = pnand %p1235_p7, %p1229_p0 }
  0x1e   : > { %1239 = shalt.err (!%p1236_p2)
}
  0x1f   : > { %s1339_s21 = smov 16   ;;  %s1340_s22 = smov 1  }
  0x20   : > { %s1685_s5 = sld [smem:[#allocation13_spill]]  ;;  %p82_p9 = scmp.eq.s32.totalorder %s81_s19, 0 }
  0x21   : > { %p91_p11 = scmp.ne.s32.totalorder %s1332_s29, %s1328_s28  ;;  %p92_p12 = scmp.eq.s32.totalorder %s1336_s30, 0 }
  0x22   : > { %p1167_p2 = scmp.lt.s32.totalorder %s1336_s30, 3  ;;  %p1687_p0 = scmp.eq.s32.totalorder %s1412_s9, 2 }
  0x23   : > { %s1461_s25 = scalar_select %p82_p9, %s1332_s29, %s84_s18  }
  0x24   : > { %p93_p13 = por %p92_p12, %p91_p11  ;;  %p1465_p3 = por %p1687_p0, %p91_p11 }
  0x25   : > { %1686 = sst [smem:[#allocation12_spill]] %s1461_s25  ;;  %s293_s10 = sand.u32 1, %s1332_s29  }
  0x26   : > { %1157 = dma.hbm_to_vmem [thread:$0]  (!%p1439_p10), %s1685_s5, 32, %s260_s15, [#allocation6], %s1339_s21, %s1339_s21, %s1340_s22  }
  0x27   : > { %s1688_s26 = scalar_select %p1465_p3, 1, 0 }
  0x28   : > { %s1037_s14 = sshll.u32 %s1336_s30, 4  ;;  %s296_s15 = scalar_lea.vmem [#allocation2], %s293_s10 }
  0x29   : > { %s1474_s17 = scalar_lea.hbm %s1666_s2, %s1037_s14  ;;  %s303_s19 = sshll.u32 %s296_s15, 4  ;;  %s304_s19 = int_to_ptr.vmem [resolvable:$true] %s303_s19 }
  0x2a   : > { %p1476_p10 = pnand %p1167_p2, %p93_p13  ;;  %s294_s21 = scalar_lea.sflag [#allocation3], %s293_s10 }
  0x2b   : > { %s1240_s22 = scalar_lea.hbm %s1474_s17, 16  ;;  %s1245_s14 = scalar_lea.hbm %s1666_s2, 48 }
  0x2c   : > { %p1241_p5 = scmp.ne.s32.totalorder %s1474_s17, %s1240_s22  ;;  %p1242_p7 = pneg %p1476_p10 }
  0x2d   : > { %p1246_p12 = scmp.lt.s32.totalorder %s1474_s17, %s1666_s2  ;;  %p1247_p2 = scmp.lt.s32.totalorder %s1245_s14, %s1240_s22 }
  0x2e   : > { %p1243_p9 = pnand %p1242_p7, %p1241_p5 }
  0x2f   : > { %p1248_p13 = por %p1247_p2, %p1246_p12 }
  0x30   : > { %p1244_p11 = pneg %p1243_p9 }
  0x32   : > { %p1249_p0 = pnand %p1248_p13, %p1244_p11 }
  0x34   : > { %1252 = shalt.err (!%p1249_p0)
}
  0x35   : > { %s1253_s15 = scalar_lea.vmem %s304_s19, 16  ;;  %s1341_s10 = smov [#allocation2]  }
  0x36   : > { %p1254_p1 = scmp.ne.s32.totalorder %s304_s19, %s1253_s15  ;;  %s1258_s5 = sshll.u32 %s1341_s10, 4  ;;  %s1259_s5 = int_to_ptr.vmem [resolvable:$false] %s1258_s5 }
  0x37   : > { %s1260_s25 = scalar_lea.vmem %s1259_s5, 32  ;;  %p1261_p5 = scmp.lt.s32.totalorder %s304_s19, %s1259_s5 }
  0x38   : > { %p1256_p6 = pnand %p1254_p1, %p1242_p7  ;;  %p1262_p9 = scmp.lt.s32.totalorder %s1260_s25, %s1253_s15 }
  0x3a   : > { %p1257_p3 = pneg %p1256_p6  ;;  %p1263_p4 = por %p1262_p9, %p1261_p5 }
  0x3c   : > { %p1264_p8 = pnand %p1263_p4, %p1257_p3 }
  0x3e   : > { %1267 = shalt.err (!%p1264_p8)
}
  0x3f   : > { %1161 = dma.hbm_to_vmem [thread:$0]  (!%p1476_p10), %s1474_s17, 16, %s304_s19, %s294_s21  }
  0x40   : > { %p1690_p11 = scmp.ne.s32.totalorder %s1682_s13, 0 }
  0x41   : > { %s1497_s22 = sand.u32 (!%p1690_p11), 1, %s1328_s28   ;;  %p1691_p1 = scmp.ne.s32.totalorder (!%p1690_p11), %s1680_s11, 0 }
  0x42   : > { %319 = sbr.rel (%p1690_p11) target bundleno = 1394 (0x572), region = 52  ;;  %s322_s23 = scalar_lea.sflag (!%p1690_p11), [#allocation3], %s1497_s22 }
  0x43   : > { %s324_s24 = scalar_lea.vmem (!%p1690_p11), [#allocation2], %s1497_s22 }
  0x47   : > { %1311 = dma.done.wait (%p1691_p1), %s322_s23, 16  }
  0x48   : > { %1313 = vsyncadd (%p1691_p1), %s322_s23, 4294967280  ;;  %p1692_p4 = scmp.eq.s32.totalorder %s1412_s9, 0 }
  0x4a   : > { %1315 = dma.done.wait (%p1692_p4), [#allocation6], 32   ;;  %p1693_p6 = pmov %p1692_p4 }
  0x4b   : > { %p372_p8 = scmp.lt.s32.totalorder %s1412_s9, 2  ;;  %v1342_v0 = vmov 0.0   ;;  %vm1343_vm0 = vmmov 0   ;;  %v391_v1 = vld [vmem:[%s1668_s4 + $0x18] sm:$0xff]  ;;  %v390_v2 = vld [vmem:[%s1668_s4 + $0x10] sm:$0xff]  ;;  %v389_v3 = vld [vmem:[%s1668_s4 + $0x8] sm:$0xff]  ;;  %v636_v19 = vlaneseq }
  0x4c   : > { %1317 = vsyncadd (%p1693_p6), [#allocation6], 4294967264  ;;  %1090 = vmatprep.subr.mxu1 %v1342_v0  ;;  %1098 = vmatprep.mubr.msk.f32.mxu1 %vm1343_vm0, %v1342_v0  ;;  %v388_v4 = vld [vmem:[%s1668_s4] sm:$0xff]  ;;  %vm399_vm1 = vcmask 261120   ;;  %v1049_v6 = vld [vmem:[%s1668_s4 + $0x38] sm:$0xff]  ;;  %vm559_vm2 = vcmask 523264  }
  0x4d   : > { %s1514_s5 = scalar_select %p372_p8, %s1412_s9, 2  ;;  %1112 = vmatprep.subr.mxu0 %v1342_v0  ;;  %1114 = vmatprep.mubr.msk.f32.mxu0 %vm1343_vm0, %v1342_v0  ;;  %v1048_v7 = vld [vmem:[%s1668_s4 + $0x30] sm:$0xff]  ;;  %v1047_v8 = vld [vmem:[%s1668_s4 + $0x28] sm:$0xff]  ;;  %v1046_v9 = vld [vmem:[%s1668_s4 + $0x20] sm:$0xff]  ;;  %v637_v20 = vshrl.u32 %v636_v19, 7  ;;  %vm650_vm4 = vcmask 60416  }
  0x4e   : > { %1091 = vmatpush3.msra.mxu1 %v391_v1  ;;  %v1050_v13 = vld [vmem:[#allocation5 + $0x1] ss:$0 sm:$0xff]  ;;  %v1044_v15 = vld [vmem:[#allocation5] ss:$0 sm:$0xff]  ;;  %v1054_v21 = vld [vmem:[%s324_s24] ss:$0 sm:$0xff] }
  0x4f   : > { %s1042_s11 = sshll.u32 %s1514_s5, 2  ;;  %1092 = vmatprep.subr.mxu1 %v1342_v0  ;;  %s1041_s17 = sshll.u32 %s1514_s5, 3  ;;  %vm642_vm3 = vcmp.eq.s32.totalorder %v1054_v21, %v637_v20  ;;  %v743_v31 = vld [vmem:[%s1670_s6 + $0x38] sm:$0xff]  ;;  %v742_v32 = vld [vmem:[%s1670_s6 + $0x30] sm:$0xff]  ;;  %v741_v33 = vld [vmem:[%s1670_s6 + $0x28] sm:$0xff]  ;;  %vm662_vm5 = vcmask 64512  }
  0x50   : > { %s379_s16 = scalar_lea.vmem %s1665_s1, %s1042_s11  ;;  %1093 = vmatpush3.msra.mxu1 %v390_v2  ;;  %s375_s20 = scalar_lea.vmem %s1664_s0, %s1041_s17  ;;  %v740_v34 = vld [vmem:[%s1670_s6 + $0x20] sm:$0xff]  ;;  %v739_v35 = vld [vmem:[%s1670_s6 + $0x18] sm:$0xff]  ;;  %v738_v36 = vld [vmem:[%s1670_s6 + $0x10] sm:$0xff]  ;;  %v1344_v42 = vmov 0   ;;  %v644_v46 = vand.u32 127, %v636_v19  ;;  %vm830_vm7 = vcmask 1043456  }
  0x51   : > { %1094 = vmatprep.subr.mxu1 %v1342_v0  ;;  %v385_v5 = vld [vmem:[%s379_s16] sm:$0xf]  ;;  %v737_v37 = vld [vmem:[%s1670_s6 + $0x8] sm:$0xff]  ;;  %s383_s25 = scalar_lea.vmem %s1667_s3, %s1041_s17  ;;  %1208 = vset.pattern.permute.xlu1 %v1344_v42  ;;  %vm826_vm8 = vcmask 31744   ;;  %s1040_s5 = sshll.u32 %s1497_s22, 3 }
  0x52   : > { %1095 = vmatpush3.msra.mxu1 %v389_v3  ;;  %v1562_v10 = vld [vmem:[%s375_s20] sm:$0xff]  ;;  %1209 = vset.pattern.permute.xlu0 %v1344_v42  ;;  %s1062_s17 = sshll.u32 %s1412_s9, 7  ;;  %s371_s21 = scalar_lea.vmem [#allocation7], %s1040_s5 }
  0x53   : > { %1096 = vmatprep.subr.mxu1 %v1342_v0  ;;  %v736_v41 = vld [vmem:[%s1670_s6] sm:$0xff]  ;;  %s920_s14 = sshll.u32 %s371_s21, 4  ;;  %s1627_s15 = scalar_lea.hbm %s1672_s8, %s1062_s17  ;;  %s921_s14 = int_to_ptr.vmem [resolvable:$true] %s920_s14 }
  0x54   : > { %1097 = vmatpush3.msra.mxu1 %v388_v4  ;;  %v387_v43 = vld [vmem:[%s383_s25] sm:$0xff]  ;;  %s907_s10 = scalar_lea.sflag [#allocation4], %s1497_s22  ;;  %s1268_s23 = scalar_lea.vmem %s921_s14, 128 }
  0x55   : > { %1099 = vmatmul.mubr.msk.f32.vlgmr.msra.gmra.mxu1 %vm399_vm1, %v385_v5  ;;  %1101 = vmatprep.subr.mxu1 %v1342_v0  ;;  %v1056_v48 = vld [vmem:[%s1671_s7] ss:$0 sm:$0xff]  ;;  %p1269_p3 = scmp.ne.s32.totalorder %s921_s14, %s1268_s23  ;;  %p1694_p10 = scmp.ne.s32.totalorder %s1688_s26, 0 }
  0x56   : > { %1102 = vmatpush3.msra.mxu1 %v1049_v6  ;;  %1109 = vmatprep.mubr.msk.f32.mxu1 %vm1343_vm0, %v1342_v0  ;;  %s1345_s9 = smov [#allocation7]  }
  0x57   : > { %1103 = vmatprep.subr.mxu1 %v1342_v0  ;;  %646 = vperm.xlu1 %1208, %v387_v43   ;;  %p1270_p7 = pnand %p1269_p3, %p1694_p10  ;;  %s1272_s13 = sshll.u32 %s1345_s9, 4  ;;  %s1273_s13 = int_to_ptr.vmem [resolvable:$false] %s1272_s13 }
  0x58   : > { %1104 = vmatpush3.msra.mxu1 %v1048_v7  ;;  %s1274_s24 = scalar_lea.vmem %s1273_s13, 256  ;;  %p1275_p2 = scmp.lt.s32.totalorder %s921_s14, %s1273_s13 }
  0x59   : > { %1105 = vmatprep.subr.mxu1 %v1342_v0  ;;  %p1271_p12 = pneg %p1270_p7  ;;  %p1276_p13 = scmp.lt.s32.totalorder %s1274_s24, %s1268_s23 }
  0x5a   : > { %1106 = vmatpush3.msra.mxu1 %v1047_v8 }
  0x5b   : > { %1107 = vmatprep.subr.mxu1 %v1342_v0  ;;  %p1277_p0 = por %p1276_p13, %p1275_p2 }
  0x5c   : > { %1108 = vmatpush3.msra.mxu1 %v1046_v9 }
  0x5d   : > { %1110 = vmatmul.mubr.msk.f32.vlgmr.msra.gmra.mxu1 %vm399_vm1, %v1562_v10  ;;  %1117 = vmatprep.subr.mxu1 %v1342_v0  ;;  %p1278_p5 = pnand %p1277_p0, %p1271_p12 }
  0x5e   : > { %1119 = vmatprep.mubr.msk.f32.mxu1 %vm1343_vm0, %v1342_v0 }
  0xd2   : > { %v647_v47 = vpop.permute.xlu1 %646 }
  0xd3   : > { %vm648_vm6 = vcmp.eq.s32.totalorder %v647_v47, %v644_v46 }
  0xd4   : > { %v1058_v51 = vsel %vm648_vm6, 1.0, %v1342_v0 }
 0x115   : > { %v469_v11 = vpop.f32.mrf.mxu1 }
 0x116   : > { %v470_v18 = vadd.f32 %v1044_v15, %v469_v11 }
 0x117   : > { %v1100_v12 = vpop.f32.mrf.mxu1 }
 0x11d   : > { %v555_v14 = vpop.f32.mrf.mxu1 }
 0x11e   : > { %v556_v16 = vadd.f32 %v1050_v13, %v555_v14 }
 0x11f   : > { %v1111_v17 = vpop.f32.mrf.mxu1 }
 0x120   : > { %1113 = vmatpush3.xpose.msk.msra.mxu0 %vm559_vm2, %v556_v16  ;;  %1118 = vmatpush3.msra.mxu1 %v556_v16 }
 0x121   : > { %1122 = vmatprep.subr.mxu0 %v1342_v0  ;;  %1141 = vmatprep.subr.mxu1 %v1342_v0 }
 0x123   : > { %1115 = vmatmul.mubr.msk.f32.vlgmr.msra.gmra.mxu0 %vm559_vm2, %v470_v18 }
 0x124   : > { %1138 = vmatprep.mubr.msk.f32.mxu0 %vm1343_vm0, %v1342_v0  ;;  %1123 = vmatpush3.msra.mxu0 %v743_v31 }
 0x125   : > { %1124 = vmatprep.subr.mxu0 %v1342_v0 }
 0x126   : > { %1125 = vmatpush3.msra.mxu0 %v742_v32 }
 0x127   : > { %1126 = vmatprep.subr.mxu0 %v1342_v0 }
 0x128   : > { %1127 = vmatpush3.msra.mxu0 %v741_v33 }
 0x129   : > { %1128 = vmatprep.subr.mxu0 %v1342_v0 }
 0x12a   : > { %1129 = vmatpush3.msra.mxu0 %v740_v34 }
 0x12b   : > { %1130 = vmatprep.subr.mxu0 %v1342_v0 }
 0x12c   : > { %1131 = vmatpush3.msra.mxu0 %v739_v35 }
 0x12d   : > { %1132 = vmatprep.subr.mxu0 %v1342_v0 }
 0x12e   : > { %1133 = vmatpush3.msra.mxu0 %v738_v36 }
 0x12f   : > { %1134 = vmatprep.subr.mxu0 %v1342_v0 }
 0x130   : > { %1135 = vmatpush3.msra.mxu0 %v737_v37 }
 0x131   : > { %1136 = vmatprep.subr.mxu0 %v1342_v0 }
 0x132   : > { %1137 = vmatpush3.msra.mxu0 %v736_v41 }
 0x1e3   : > { %v632_v22 = vpop.f32.mrf.mxu0 }
 0x1e4   : > { %v649_v23 = vsel %vm642_vm3, %v632_v22, -1e+30 }
 0x1e5   : > { %v1116_v24 = vpop.f32.mrf.mxu0  ;;  %v651_v25 = vsel %vm650_vm4, %v649_v23, -inf }
 0x1e6   : > { %652 = vmax.xlane.f32.xlu0 %v651_v25 }
 0x26f   : > { %v653_v26 = vpop.xlane.xlu0 %652 }
 0x270   : > { %v654_v27 = vsub.f32 %v649_v23, %v653_v26 }
 0x272   : > { %v655_v28 = vmul.f32 1.442695, %v654_v27 }
 0x274   : > { %1210 = vpow2.f32 %v655_v28 }
 0x281   : > { %v1211_v29 = vpop.eup %1210 }
 0x282   : > { %v657_v30 = vsel %vm650_vm4, %v1211_v29, 0.0 }
 0x283   : > { %658 = vadd.xlane.f32.xlu0 %v657_v30 }
 0x30c   : > { %v659_v38 = vpop.xlane.xlu0 %658 }
 0x30d   : > { %1212 = vrcp.f32 %v659_v38 }
 0x31a   : > { %v1213_v39 = vpop.eup %1212 }
 0x31b   : > { %v661_v40 = vmul.f32 %v1213_v39, %v1211_v29 }
 0x31d   : > { %1120 = vmatmul.mubr.msk.f32.vlgmr.msra.gmra.mxu1 %vm662_vm5, %v661_v40 }
 0x31e   : > { %1143 = vmatprep.mubr.msk.f32.mxu1 %vm1343_vm0, %v1342_v0 }
 0x3dd   : > { %v732_v44 = vpop.f32.mrf.mxu1 }
 0x3de   : > { %1139 = vmatmul.mubr.msk.f32.vlgmr.msra.gmra.mxu0 %vm559_vm2, %v732_v44 }
 0x3df   : > { %v1121_v45 = vpop.f32.mrf.mxu1 }
 0x49e   : > { %v820_v49 = vpop.f32.mrf.mxu0 }
 0x49f   : > { %v821_v50 = vadd.f32 %v1056_v48, %v820_v49 }
 0x4a0   : > { %v1140_v52 = vpop.f32.mrf.mxu0 }
 0x4a1   : > { %1142 = vmatpush3.msk.msra.mxu1 %vm830_vm7, %v821_v50 }
 0x4a2   : > { %1144 = vmatmul.mubr.msk.f32.vlgmr.msra.gmra.mxu1 %vm826_vm8, %v1058_v51 }
 0x562   : > { %v900_v53 = vpop.f32.mrf.mxu1 }
 0x563   : > { %v904_v54 = vadd.f32 %v900_v53, %v1562_v10 }
 0x564   : > { %v1145_v55 = vpop.f32.mrf.mxu1 }
 0x565   : > { %905 = vst.msk [vmem:[%s371_s21] sm:$0xff] %vm399_vm1, %v904_v54 }
 0x566   : > { %1281 = shalt.err (!%p1278_p5)
}
 0x567   : > { %s1282_s11 = scalar_lea.hbm %s1627_s15, 128  ;;  %s1286_s19 = scalar_lea.hbm %s1672_s8, 384 }
 0x568   : > { %p1283_p9 = scmp.ne.s32.totalorder %s1627_s15, %s1282_s11  ;;  %p1287_p4 = scmp.lt.s32.totalorder %s1627_s15, %s1672_s8 }
 0x569   : > { %p1288_p6 = scmp.lt.s32.totalorder %s1286_s19, %s1282_s11 }
 0x56a   : > { %p1284_p11 = pnand %p1283_p9, %p1694_p10 }
 0x56b   : > { %p1289_p8 = por %p1288_p6, %p1287_p4 }
 0x56c   : > { %p1285_p1 = pneg %p1284_p11 }
 0x56e   : > { %p1290_p3 = pnand %p1289_p8, %p1285_p1 }
 0x570   : > { %1293 = shalt.err (!%p1290_p3)
}
 0x571   : > { %1152 = dma.vmem_to_hbm [thread:$0]  (%p1694_p10), %s921_s14, 128, %s1627_s15, %s907_s10  }
 0x572 PF: > { %p1169_p7 = scmp.ge.s32.totalorder %s1336_s30, 2  ;;  %s932_s17 = sand.u32 1, %s1324_s27  }
 0x573   : > { %p1695_p12 = scmp.ne.s32.totalorder %s1681_s12, 0  ;;  %s933_s21 = scalar_lea.sflag [#allocation4], %s932_s17 }
 0x575   : > { %p1163_p2 = pnand %p1169_p7, %p1695_p12 }
 0x577   : > { %p1164_p13 = pneg %p1163_p2 }
 0x579   : > { %1319 = dma.done.wait (%p1164_p13), %s933_s21, 128  }
 0x57a   : > { %1321 = vsyncadd (%p1164_p13), %s933_s21, 4294967168  ;;  %s1696_s30 = sld [smem:[#allocation11_spill]]  ;;  %s1698_s27 = smov %s1328_s28 }
 0x57b   : > { %s1697_s20 = sld [smem:[#allocation12_spill]]  ;;  %s1699_s28 = smov %s1332_s29 }
 0x580   : > { %p22_p0 = scmp.ge.s32.totalorder %s1696_s30, 5  }
 0x581   : > { %s1700_s29 = smov %s1697_s20 }
 0x582   :  { %24 = sbr.rel (!%p22_p0) target bundleno = 8 (0x8), region = 112 }
 0x587   :  { %938 = vsyncpa [#allocation3], 1 }
 0x588   :  { %940 = vsyncpa [#allocation3 + $0x1], 1 }
 0x589   :  { %941 = vsyncpa [#allocation6], 1 }
 0x58a   :  { %942 = vsyncpa [#allocation4], 1 }
 0x58b   :  { %944 = vsyncpa [#allocation4 + $0x1], 1 }

</bundles_post_ra>
